<compile_context>
chip_gen: v7x
topology: tpu7x:2x2x1
jax: 0.10.0
libtpu: 0.0.40
codegen_flags: <defaults>
</compile_context>

<pallas_src>
import math

import jax
import jax.numpy as jnp
import numpy as np
from jax.experimental import pallas as pl
from jax.experimental.pallas import tpu as pltpu


def _power_kernel(x_ref, p_ref, o_ref):
    # x_ref: (tm, K) folded input tile, p_ref: (K, OW) block-diagonal pooling
    # matrix, o_ref: (tm, OW) folded output tile.
    x = x_ref[...]
    sq = x * x                                               # VPU elementwise square
    pooled = jnp.dot(sq, p_ref[...],                         # average pool as MXU matmul
                     preferred_element_type=jnp.float32)
    o_ref[...] = jnp.log(pooled)                             # log-power (EUP)


def _round_up(x: int, m: int) -> int:
    return (x + m - 1) // m * m


def _make_block_pool_matrix(w: int, w_out: int, length: int, step: int, g: int):
    """Block-diagonal pooling matrix of shape (g*w, g*w_out), built host-side."""
    p = np.zeros((w, w_out), np.float32)
    for j in range(w_out):
        p[j * step: j * step + length, j] = 1.0 / length
    big = np.einsum("ab,wj->awbj", np.eye(g, dtype=np.float32), p)
    return jnp.asarray(big.reshape(g * w, g * w_out))


def _device_params():
    """Per-TPU-generation tiling parameters."""
    kind = ""
    try:
        kind = jax.devices()[0].device_kind.lower()
    except Exception:
        pass
    if "v7" in kind or "7x" in kind:
        # v7x: 64 MiB physical VMEM, 2 TensorCores, 3.2 TB/s HBM.
        return dict(vmem_limit=48 << 20, vmem_budget=40 << 20, tm_cap=16384,
                    min_steps=8, max_intensity=48.0)
    if any(v in kind for v in ("v2", "v3", "v4", "v5")):
        # v5e and older: 128 MiB VMEM, 1 TC, lowest f32-MXU/HBM ratio
        # -> keep the fold small enough to stay strictly HBM-bound.
        return dict(vmem_limit=64 << 20, vmem_budget=56 << 20, tm_cap=16384,
                    min_steps=4, max_intensity=24.0)
    if "v6" in kind:
        # v6e: 128 MiB physical VMEM, 1 TC.
        return dict(vmem_limit=64 << 20, vmem_budget=56 << 20, tm_cap=16384,
                    min_steps=4, max_intensity=48.0)
    # Unknown chip: conservative defaults that fit every generation.
    return dict(vmem_limit=32 << 20, vmem_budget=24 << 20, tm_cap=8192,
                min_steps=8, max_intensity=24.0)


def _choose_fold(w: int, w_out: int, r: int, max_intensity: float) -> int:
    """Pick the fold factor G.

    Requirements: G*W a multiple of 128 (lane-dense input), arithmetic
    intensity (wasted block-diagonal FLOPs scale with G) under the
    generation-specific roofline cap, K = G*W <= 2048, and preferably G | r so
    no host-side padding copy is needed.  Larger G => better output-lane
    occupancy and MXU fill.
    """
    g0 = max(1, math.lcm(w, 128) // w)
    bytes_per_row = 4.0 * (w + w_out)
    candidates = []
    g = g0
    while g * w <= 2048:
        intensity = 2.0 * g * w * w_out / bytes_per_row
        if candidates and intensity > max_intensity:
            break
        candidates.append(g)
        g *= 2
    if not candidates:
        candidates = [1]
    divisible = [c for c in candidates if r % c == 0]
    return max(divisible) if divisible else max(candidates)


def power_layer(x: jnp.ndarray, length: int, step: int) -> jnp.ndarray:
    """x: (N, C, H, W) float32 -> (N, C, H, W_out) float32."""
    n, c, h, w = x.shape
    w_out = (w - length) // step + 1
    r = n * c * h
    params = _device_params()

    g = _choose_fold(w, w_out, r, params["max_intensity"])
    k_dim = g * w
    ow = g * w_out

    x2d = x.reshape(r, w).astype(jnp.float32)
    r_pad = _round_up(r, g)
    if r_pad != r:
        # Correctness fallback only (extra HBM pass); _choose_fold prefers g | r.
        # Pad value 1.0 -> pooled 1 -> log 0; padded rows are sliced off below.
        x2d = jnp.concatenate([x2d, jnp.ones((r_pad - r, w), jnp.float32)], axis=0)
    rf = r_pad // g
    x_fold = x2d.reshape(rf, k_dim)

    pool_mat = _make_block_pool_matrix(w, w_out, length, step, g)

    # VMEM accounting per folded row: double-buffered input + output pipeline
    # buffers PLUS the in-kernel `sq` (tm*K) and `pooled` (tm*OW) f32
    # temporaries that the MXU boundary materializes -> 3x, not 2x.
    p_bytes = 2 * k_dim * ow * 4                     # pool matrix (double-buffered)
    row_bytes = 4 * (3 * k_dim + 3 * ow)
    tm_vmem = max(8, (params["vmem_budget"] - p_bytes) // row_bytes // 8 * 8)
    # Enough grid steps for DMA/compute overlap (and 2-core balance on v7x).
    tm_pipe = max(8, _round_up(pl.cdiv(rf, params["min_steps"]), 8))
    tm = min(tm_vmem, tm_pipe, params["tm_cap"])
    if tm >= rf:
        tm = rf if (rf % 8 == 0 or rf < 8) else _round_up(rf, 8)
    grid = (pl.cdiv(rf, tm),)                        # partial tail block is fine

    cost = pl.CostEstimate(
        flops=2 * rf * k_dim * ow,
        transcendentals=rf * ow,
        bytes_accessed=4 * (rf * (k_dim + ow) + k_dim * ow),
    )

    out_fold = pl.pallas_call(
        _power_kernel,
        out_shape=jax.ShapeDtypeStruct((rf, ow), jnp.float32),
        grid_spec=pltpu.PrefetchScalarGridSpec(
            num_scalar_prefetch=0,
            grid=grid,
            in_specs=[
                pl.BlockSpec((tm, k_dim), lambda i: (i, 0)),
                pl.BlockSpec((k_dim, ow), lambda i: (0, 0)),
            ],
            out_specs=pl.BlockSpec((tm, ow), lambda i: (i, 0)),
        ),
        compiler_params=pltpu.CompilerParams(
            dimension_semantics=("parallel",),
            vmem_limit_bytes=params["vmem_limit"]),
        cost_estimate=cost,
    )(x_fold, pool_mat)

    out2d = out_fold.reshape(r_pad, w_out)
    if r_pad != r:
        out2d = out2d[:r]
    return out2d.reshape(n, c, h, w_out)


def power_layer_ref(x: jnp.ndarray, length: int, step: int) -> jnp.ndarray:
    """Pure-JAX reference of torch.log(AvgPool2d((1,length),(1,step))(x**2))."""
    n, c, h, w = x.shape
    w_out = (w - length) // step + 1
    sq = x * x
    windows = jnp.stack(
        [sq[..., j * step: j * step + length].mean(axis=-1) for j in range(w_out)],
        axis=-1,
    )
    return jnp.log(windows)


if __name__ == "__main__":
    # PowerLayer(dim=-1, length=4, step=2) on an NCHW input.
    N, C, H, W = 2, 4, 16, 16
    LENGTH, STEP = 4, 2

    key = jax.random.PRNGKey(0)
    x = jax.random.normal(key, (N, C, H, W), dtype=jnp.float32)

    out = power_layer(x, LENGTH, STEP)
    out = jax.block_until_ready(out)

    ref = power_layer_ref(x, LENGTH, STEP)
    assert out.shape == (N, C, H, (W - LENGTH) // STEP + 1), out.shape
    assert jnp.allclose(out, ref, atol=1e-5, rtol=1e-5), float(jnp.max(jnp.abs(out - ref)))

    print("KERNEL_OK")
</pallas_src>

<mosaic_0001>
module attributes {stable_mosaic.version = 11 : i64} {
  func.func @_power_kernel(%arg0: i32, %arg1: memref<8x128xf32, #tpu.memory_space<vmem>>, %arg2: memref<128x56xf32, #tpu.memory_space<vmem>>, %arg3: memref<8x56xf32, #tpu.memory_space<vmem>>) attributes {dimension_semantics = [#tpu.dimension_semantics<parallel>], iteration_bounds = array<i64: 2>, scalar_prefetch = 0 : i64, scratch_operands = 0 : i64, tpu.core_type = #tpu.core_type<tc>, window_params = [{transform_indices = @transform_0, window_bounds = array<i64: 8, 128>}, {pipeline_mode = #tpu.pipeline_mode<synchronous>, transform_indices = @transform_1, window_bounds = array<i64: 128, 56>}, {transform_indices = @transform_2, window_bounds = array<i64: 8, 56>}]} {
    %c0 = arith.constant 0 : index
    %c0_0 = arith.constant 0 : index
    %0 = vector.load %arg1[%c0, %c0_0] : memref<8x128xf32, #tpu.memory_space<vmem>>, vector<8x128xf32>
    %1 = arith.mulf %0, %0 : vector<8x128xf32>
    %c0_1 = arith.constant 0 : index
    %c0_2 = arith.constant 0 : index
    %2 = vector.load %arg2[%c0_1, %c0_2] : memref<128x56xf32, #tpu.memory_space<vmem>>, vector<128x56xf32>
    %cst = arith.constant dense<0.000000e+00> : vector<8x56xf32>
    %3 = tpu.matmul %1, %2, %cst {dimension_numbers = #tpu.dot_dimension_numbers<[1], [0], [0], [1], [0, 0, 1, 1], [], []>} : vector<8x128xf32>, vector<128x56xf32>, vector<8x56xf32> -> vector<8x56xf32>
    %4 = math.log %3 : vector<8x56xf32>
    %c0_3 = arith.constant 0 : index
    %c0_4 = arith.constant 0 : index
    %5 = vector.load %arg3[%c0_3, %c0_4] : memref<8x56xf32, #tpu.memory_space<vmem>>, vector<8x56xf32>
    tpu.vector_store %arg3[%c0_3, %c0_4], %4 {strides = array<i32>} : memref<8x56xf32, #tpu.memory_space<vmem>>, vector<8x56xf32>,
    return
  }
  func.func @transform_0(%arg0: i32) -> (i32, i32) {
    %c0_i32 = arith.constant 0 : i32
    %c0_i32_0 = arith.constant 0 : i32
    return %arg0, %c0_i32 : i32, i32
  }
  func.func @transform_1(%arg0: i32) -> (i32, i32) {
    %c0_i32 = arith.constant 0 : i32
    %c0_i32_0 = arith.constant 0 : i32
    %c0_i32_1 = arith.constant 0 : i32
    return %c0_i32, %c0_i32_0 : i32, i32
  }
  func.func @transform_2(%arg0: i32) -> (i32, i32) {
    %c0_i32 = arith.constant 0 : i32
    %c0_i32_0 = arith.constant 0 : i32
    return %arg0, %c0_i32 : i32, i32
  }
}

</mosaic_0001>

<bundles_post_ra>
// kernel: tpu_custom_call.1
= control target key start
LH: loop header
LB: loop body
LE: loop exit
PB: predicated region body
PF: predicated region fallthrough
CT: control target
= control target key end

     0   :  { %7 = vsyncpa [#allocation3], 0  ;;  %s665_s0 = inlined_call_operand.vmem [shape: f32[16,128], index: 0, kind: input, shape index: {}]   ;;  %s666_s1 = inlined_call_operand.vmem [shape: f32[128,56], index: 1, kind: input, shape index: {}]   ;;  %s667_s2 = inlined_call_operand.hbm [shape: f32[16,56], index: 2, kind: output, shape index: {}]  }
   0x1   :  { %9 = vsyncpa [#allocation3 + $0x1], 0  ;;  %s517_s9 = smov 0   ;;  %s519_s10 = smov 0  }
   0x2   :  { %s521_s11 = smov 0   ;;  %s523_s12 = smov 0  }
   0x3 LB: > { %s538_s13 = sadd.s32 4294967295, %s496_s12   ;;  %s304_s14 = sadd.s32 4294967294, %s496_s12   ;;  %s496_s12 = sphi %s523_s12, %s673_s12   ;;  %s492_s11 = sphi %s521_s11, %s672_s11   ;;  %s488_s10 = sphi %s519_s10, %s671_s10   ;;  %s484_s9 = sphi %s517_s9, %s670_s9  }
   0x4   : > { %s542_s15 = sadd.s32 1, %s496_s12   ;;  %s69_s16 = sadd.s32 1, %s492_s11 }
   0x5   : > { %s66_s17 = ssub.s32 %s496_s12, %s542_s15  ;;  %p79_p0 = scmp.ne.s32.totalorder %s492_s11, %s488_s10 }
   0x6   : > { %p67_p1 = scmp.eq.s32.totalorder %s66_s17, 0  ;;  %p80_p2 = scmp.eq.s32.totalorder %s538_s13, 1 }
   0x7   : > { %p85_p3 = scmp.ne.s32.totalorder %s488_s10, %s484_s9  ;;  %p86_p4 = scmp.eq.s32.totalorder %s304_s14, 1 }
   0x8   : > { %s553_s18 = scalar_select %p67_p1, %s492_s11, %s69_s16  }
   0x9   : > { %p555_p5 = por %p80_p2, %p79_p0  ;;  %p559_p6 = por %p86_p4, %p85_p3 }
   0xa   : > { %p307_p7 = scmp.ge.s32.totalorder %s496_s12, 1  ;;  %p114_p8 = scmp.lt.s32.totalorder %s496_s12, 3 }
   0xc   : > { %p115_p9 = pnand %p307_p7, %p114_p8 }
   0xd   : > { %v141_v0 = vld [vmem:[%s666_s1] sm:$0xff] (!%p115_p9)  ;;  %v142_v1 = vld [vmem:[%s666_s1 + $0x8] sm:$0xff] (!%p115_p9)  ;;  %v143_v2 = vld [vmem:[%s666_s1 + $0x10] sm:$0xff] (!%p115_p9)  ;;  %v498_v3 = vmov (!%p115_p9), 0.0|0.0   ;;  %vm499_vm0 = vmmov (!%p115_p9), 0   ;;  %v500_v6 = vmov (!%p115_p9), 0.0  }
   0xe   : > { %118 = sbr.rel (%p115_p9) target bundleno = 286 (0x11e), region = 28  ;;  %366 = vmatprep.subr.bf16.mxu0 (!%p115_p9), %v498_v3  ;;  %v367_v4 = vpack.c.bf16 (!%p115_p9), %v142_v1, %v141_v0  ;;  %v144_v5 = vld [vmem:[%s666_s1 + $0x18] sm:$0xff] (!%p115_p9)  ;;  %363 = vmatprep.mubr.msk.f32.mxu0 (!%p115_p9), %vm499_vm0, %v500_v6  ;;  %v145_v8 = vld [vmem:[%s666_s1 + $0x20] sm:$0xff] (!%p115_p9)  ;;  %v146_v9 = vld [vmem:[%s666_s1 + $0x28] sm:$0xff] (!%p115_p9)  ;;  %p135_p10 = scmp.lt.s32.totalorder (!%p115_p9), %s538_s13, 1  ;;  %vm229_vm1 = vcmask (!%p115_p9), 457728  }
   0xf   : > { %v370_v7 = vpack.c.bf16 (!%p115_p9), %v144_v5, %v143_v2  ;;  %v373_v10 = vpack.c.bf16 (!%p115_p9), %v146_v9, %v145_v8  ;;  %v147_v11 = vld [vmem:[%s666_s1 + $0x30] sm:$0xff] (!%p115_p9)  ;;  %v148_v12 = vld [vmem:[%s666_s1 + $0x38] sm:$0xff] (!%p115_p9)  ;;  %v149_v14 = vld [vmem:[%s666_s1 + $0x40] sm:$0xff] (!%p115_p9)  ;;  %s132_s17 = sand.u32 (!%p115_p9), 1, %s488_s10   ;;  %s311_s22 = sshll.u32 (!%p115_p9), %s538_s13, 7 }
  0x10   : > { %368 = vmatpush3.bf16.msra.mxu0 (!%p115_p9), %v367_v4  ;;  %v376_v13 = vpack.c.bf16 (!%p115_p9), %v148_v12, %v147_v11  ;;  %v150_v15 = vld [vmem:[%s666_s1 + $0x48] sm:$0xff] (!%p115_p9)  ;;  %v151_v17 = vld [vmem:[%s666_s1 + $0x50] sm:$0xff] (!%p115_p9)  ;;  %v152_v18 = vld [vmem:[%s666_s1 + $0x58] sm:$0xff] (!%p115_p9)  ;;  %s308_s21 = sshll.u32 (!%p115_p9), %s132_s17, 3  ;;  %s623_s27 = scalar_lea.hbm (!%p115_p9), %s667_s2, %s311_s22 }
  0x11   : > { %369 = vmatprep.subr.bf16.mxu0 (!%p115_p9), %v498_v3  ;;  %v379_v16 = vpack.c.bf16 (!%p115_p9), %v150_v15, %v149_v14  ;;  %v382_v19 = vpack.c.bf16 (!%p115_p9), %v152_v18, %v151_v17  ;;  %v153_v20 = vld [vmem:[%s666_s1 + $0x60] sm:$0xff] (!%p115_p9)  ;;  %v154_v21 = vld [vmem:[%s666_s1 + $0x68] sm:$0xff] (!%p115_p9)  ;;  %v155_v23 = vld [vmem:[%s666_s1 + $0x70] sm:$0xff] (!%p115_p9)  ;;  %s134_s23 = scalar_lea.vmem (!%p115_p9), [#allocation2], %s308_s21  ;;  %s232_s28 = scalar_lea.sflag (!%p115_p9), [#allocation3], %s132_s17 }
  0x12   : > { %v385_v22 = vpack.c.bf16 (!%p115_p9), %v154_v21, %v153_v20  ;;  %v156_v24 = vld [vmem:[%s666_s1 + $0x78] sm:$0xff] (!%p115_p9)  ;;  %s245_s24 = sshll.u32 (!%p115_p9), %s134_s23, 4  ;;  %s625_s24 = int_to_ptr.vmem [resolvable:$true] %s245_s24 }
  0x13   : > { %v388_v25 = vpack.c.bf16 (!%p115_p9), %v156_v24, %v155_v23  ;;  %s434_s29 = scalar_lea.vmem (!%p115_p9), %s625_s24, 128 }
  0x14   : > { %371 = vmatpush3.bf16.msra.mxu0 (!%p115_p9), %v370_v7  ;;  %p435_p11 = scmp.ne.s32.totalorder (!%p115_p9), %s625_s24, %s434_s29 }
  0x15   : > { %372 = vmatprep.subr.bf16.mxu0 %v498_v3  ;;  %s136_s26 = scalar_select %p135_p10, %s538_s13, 1 }
  0x16   : > { %p436_p12 = pnand %p435_p11, %p555_p5  ;;  %s501_s13 = smov [#allocation2]  }
  0x17   : > { %s309_s3 = sshll.u32 %s136_s26, 3  ;;  %s438_s30 = sshll.u32 %s501_s13, 4  ;;  %s439_s30 = int_to_ptr.vmem [resolvable:$false] %s438_s30 }
  0x18   : > { %374 = vmatpush3.bf16.msra.mxu0 %v373_v10  ;;  %s138_s16 = scalar_lea.vmem %s665_s0, %s309_s3  ;;  %p437_p13 = pneg %p436_p12 }
  0x19   : > { %375 = vmatprep.subr.bf16.mxu0 %v498_v3  ;;  %v139_v26 = vld [vmem:[%s138_s16] sm:$0xff]  ;;  %s440_s3 = scalar_lea.vmem %s439_s30, 256  ;;  %p441_p0 = scmp.lt.s32.totalorder %s625_s24, %s439_s30 }
  0x1a   : > { %v140_v27 = vmul.f32 %v139_v26, %v139_v26  ;;  %p442_p1 = scmp.lt.s32.totalorder %s440_s3, %s434_s29 }
  0x1c   : > { %377 = vmatpush3.bf16.msra.mxu0 %v376_v13  ;;  %p443_p2 = por %p442_p1, %p441_p0 }
  0x1d   : > { %378 = vmatprep.subr.bf16.mxu0 %v498_v3 }
  0x1e   : > { %p444_p3 = pnand %p443_p2, %p437_p13 }
  0x20   : > { %380 = vmatpush3.bf16.msra.mxu0 %v379_v16 }
  0x21   : > { %381 = vmatprep.subr.bf16.mxu0 %v498_v3 }
  0x24   : > { %383 = vmatpush3.bf16.msra.mxu0 %v382_v19 }
  0x25   : > { %384 = vmatprep.subr.bf16.mxu0 %v498_v3 }
  0x28   : > { %386 = vmatpush3.bf16.msra.mxu0 %v385_v22 }
  0x29   : > { %387 = vmatprep.subr.bf16.mxu0 %v498_v3 }
  0x2c   : > { %389 = vmatpush3.bf16.msra.mxu0 %v388_v25 }
  0x2f   : > { %364 = vmatmul.mubr.f32.vlgmr.msra.gmra.mrb[0].mxu0 %v140_v27 }
 0x102   : > { %v223_v28 = vpop.f32.mrb[0].mxu0 }
 0x103   : > { %432 = vlog2.f32 %v223_v28  ;;  %v365_v29 = vpop.f32.mrb[1].mxu0 }
 0x10d   : > { %v433_v30 = vpop.eup %432 }
 0x10e   : > { %v228_v31 = vmul.f32 0.6931472, %v433_v30 }
 0x110   : > { %230 = vst.msk [vmem:[%s134_s23] sm:$0xff] %vm229_vm1, %v228_v31 }
 0x111   : > { %447 = shalt.err (!%p444_p3)
}
 0x112   : > { %s448_s4 = scalar_lea.hbm %s623_s27, 128  ;;  %s452_s7 = scalar_lea.hbm %s667_s2, 256 }
 0x113   : > { %p449_p4 = scmp.ne.s32.totalorder %s623_s27, %s448_s4  ;;  %p453_p9 = scmp.lt.u32.totalorder %s623_s27, %s667_s2 }
 0x114   : > { %p454_p10 = scmp.lt.u32.totalorder %s452_s7, %s448_s4  ;;  %p456_p12 = scmp.lt.u32.totalorder %s448_s4, %s623_s27 }
 0x115   : > { %p450_p7 = pnand %p449_p4, %p555_p5 }
 0x116   : > { %p455_p11 = por %p454_p10, %p453_p9 }
 0x117   : > { %p451_p8 = pneg %p450_p7 }
 0x118   : > { %p457_p13 = por %p456_p12, %p455_p11 }
 0x11a   : > { %p458_p0 = pnand %p457_p13, %p451_p8 }
 0x11c   : > { %461 = shalt.err (!%p458_p0)
}
 0x11d   : > { %390 = dma.vmem_to_hbm [thread:$0]  (%p555_p5), %s625_s24, 128, %s623_s27, %s232_s28  }
 0x11e PF: > { %p396_p1 = scmp.ge.s32.totalorder %s496_s12, 2  ;;  %s257_s16 = sand.u32 1, %s484_s9  }
 0x11f   : > { %s258_s17 = scalar_lea.sflag [#allocation3], %s257_s16 }
 0x120   : > { %p393_p2 = pnand %p396_p1, %p559_p6 }
 0x122   : > { %479 = dma.done.wait (!%p393_p2), %s258_s17, 128  }
 0x123   : > { %481 = vsyncadd (!%p393_p2), %s258_s17, 4294967168  ;;  %p12_p3 = scmp.ge.s32.totalorder %s542_s15, 4   ;;  %s670_s9 = smov %s488_s10 }
 0x124   : > { %s671_s10 = smov %s492_s11  ;;  %s672_s11 = smov %s553_s18 }
 0x125   : > { %s673_s12 = smov %s542_s15  ;;  %14 = sbr.rel (!%p12_p3) target bundleno = 3 (0x3), region = 63 }
 0x12c   :  { %263 = vsyncpa [#allocation3], 1 }
 0x12d   :  { %265 = vsyncpa [#allocation3 + $0x1], 1 }

</bundles_post_ra>
